<compile_context>
chip_gen: v7x
topology: tpu7x:2x2x1
jax: 0.10.0
libtpu: 0.0.40
codegen_flags: <defaults>
</compile_context>

<pallas_src>
import jax
import jax.numpy as jnp
from jax.experimental import pallas as pl
from jax.experimental.pallas import tpu as pltpu

_HIGHEST = jax.lax.Precision.HIGHEST


# ---------------------------------------------------------------------------
# Shared in-kernel gate math.
# ---------------------------------------------------------------------------
def _lstm_gates(pre, c, H):
    """pre: (B, 4H) packed [i | f | o | g]; c: (B, H). Returns (h_new, c_new)."""
    lane = jax.lax.broadcasted_iota(jnp.int32, pre.shape, 1)
    # One sigmoid + one tanh over the full lane-dense vreg, merged with a
    # select (avoids intra-vreg slicing before the EUP passes).
    act = jnp.where(lane < 3 * H, jax.nn.sigmoid(pre), jnp.tanh(pre))
    i_g = act[:, 0 * H:1 * H]
    f_g = act[:, 1 * H:2 * H]
    o_g = act[:, 2 * H:3 * H]
    g_g = act[:, 3 * H:4 * H]
    c_new = f_g * c + i_g * g_g
    h_new = o_g * jnp.tanh(c_new)
    return h_new, c_new


# ---------------------------------------------------------------------------
# Single-cell kernel (matches the PyTorch forward exactly).
# ---------------------------------------------------------------------------
def lstm_cell_kernel(x_ref, h_ref, c_ref, wx_ref, wh_ref, b_ref,
                     h_out_ref, c_out_ref):
    H = c_out_ref.shape[-1]
    pre = (jnp.dot(x_ref[...], wx_ref[...],
                   preferred_element_type=jnp.float32, precision=_HIGHEST)
           + jnp.dot(h_ref[...], wh_ref[...],
                     preferred_element_type=jnp.float32, precision=_HIGHEST)
           + b_ref[...])
    h_new, c_new = _lstm_gates(pre, c_ref[...], H)
    h_out_ref[...] = h_new.astype(h_out_ref.dtype)
    c_out_ref[...] = c_new.astype(c_out_ref.dtype)


# ---------------------------------------------------------------------------
# Fused-sequence kernel: the T-step recurrence runs inside one pallas_call.
# Weights/bias/initial state are VMEM-resident (constant index maps); h is
# carried in VMEM scratch, c in the resident output block.
# ---------------------------------------------------------------------------
def lstm_seq_kernel(x_ref, wx_ref, wh_ref, b_ref, h0_ref, c0_ref,
                    h_seq_ref, c_out_ref, h_scratch):
    t = pl.program_id(0)
    H = c_out_ref.shape[-1]

    @pl.when(t == 0)
    def _():
        h_scratch[...] = h0_ref[...]
        c_out_ref[...] = c0_ref[...]

    h = h_scratch[...]
    c = c_out_ref[...]
    pre = (jnp.dot(x_ref[0], wx_ref[...],
                   preferred_element_type=jnp.float32, precision=_HIGHEST)
           + jnp.dot(h, wh_ref[...],
                     preferred_element_type=jnp.float32, precision=_HIGHEST)
           + b_ref[...])
    h_new, c_new = _lstm_gates(pre, c, H)

    h_scratch[...] = h_new
    c_out_ref[...] = c_new
    h_seq_ref[...] = h_new[None].astype(h_seq_ref.dtype)


# ---------------------------------------------------------------------------
# Parameter packing — done ONCE at parameter-setup time (outside jit).
# ---------------------------------------------------------------------------
def pack_lstm_params(w_ih, w_hh, b_ih, b_hh):
    """w_ih, w_hh: (4, I, H) in module gate order [i, f, g, o]; b_*: (4, H).

    Returns wx (I, 4H), wh (I, 4H), b (1, 4H) reordered to [i, f, o, g].
    """
    # The module applies h @ w_hh with w_hh of shape (4, input_size, hidden),
    # so the recurrence is only well-formed when input_size == hidden_size.
    assert w_hh.shape[1] == w_ih.shape[2], (
        "LSTMCell recurrence requires input_size == hidden_size")
    order = (0, 1, 3, 2)  # [i, f, o, g]
    wx = jnp.concatenate([w_ih[g] for g in order], axis=-1)          # (I, 4H)
    wh = jnp.concatenate([w_hh[g] for g in order], axis=-1)          # (I, 4H)
    b = jnp.concatenate([(b_ih + b_hh)[g] for g in order],
                        axis=-1)[None, :]                            # (1, 4H)
    return wx, wh, b


# ---------------------------------------------------------------------------
# Wrappers.
# ---------------------------------------------------------------------------
@jax.jit
def lstm_cell(x, h, c, wx_packed, wh_packed, b_packed):
    B, H = c.shape
    vmem = pl.BlockSpec(memory_space=pltpu.MemorySpace.VMEM)
    return pl.pallas_call(
        lstm_cell_kernel,
        out_shape=(jax.ShapeDtypeStruct((B, H), jnp.float32),
                   jax.ShapeDtypeStruct((B, H), jnp.float32)),
        in_specs=[vmem] * 6,
        out_specs=(vmem, vmem),
        # P8: update the recurrent state in place (h -> h_out, c -> c_out).
        input_output_aliases={1: 0, 2: 1},
    )(x, h, c, wx_packed, wh_packed, b_packed)


@jax.jit
def lstm_sequence(xs, h0, c0, wx_packed, wh_packed, b_packed):
    """Runs T LSTM-cell steps in a single kernel launch.

    xs: (T, B, I).  Returns (h_seq (T, B, H), c_last (B, H)).
    """
    T, B, I = xs.shape
    H = c0.shape[-1]
    G = wx_packed.shape[-1]          # 4*H
    Ih = wh_packed.shape[0]          # == H (asserted at pack time)
    return pl.pallas_call(
        lstm_seq_kernel,
        out_shape=(jax.ShapeDtypeStruct((T, B, H), jnp.float32),
                   jax.ShapeDtypeStruct((B, H), jnp.float32)),
        grid_spec=pltpu.PrefetchScalarGridSpec(
            num_scalar_prefetch=0,
            grid=(T,),
            in_specs=[
                pl.BlockSpec((1, B, I), lambda t: (t, 0, 0)),   # x_t per step
                pl.BlockSpec((I, G), lambda t: (0, 0)),         # Wx resident
                pl.BlockSpec((Ih, G), lambda t: (0, 0)),        # Wh resident
                pl.BlockSpec((1, G), lambda t: (0, 0)),         # bias resident
                pl.BlockSpec((B, H), lambda t: (0, 0)),         # h0 (once)
                pl.BlockSpec((B, H), lambda t: (0, 0)),         # c0 (once)
            ],
            out_specs=(
                pl.BlockSpec((1, B, H), lambda t: (t, 0, 0)),   # h per step
                pl.BlockSpec((B, H), lambda t: (0, 0)),         # resident c
            ),
            scratch_shapes=[pltpu.VMEM((B, H), jnp.float32)],   # carried h
        ),
        compiler_params=pltpu.CompilerParams(
            dimension_semantics=("arbitrary",)),                # recurrence
    )(xs, wx_packed, wh_packed, b_packed, h0, c0)
# TODO(synk): for large batches on v7x, add a leading "parallel" grid axis
# over B blocks so both TensorCores are used (T itself is sequential).


# ---------------------------------------------------------------------------
# Pure-JAX reference (mirrors the PyTorch forward).
# ---------------------------------------------------------------------------
def lstm_cell_reference(x, h, c, w_ih, w_hh, b_ih, b_hh):
    ih = jnp.matmul(x[None, :, :], w_ih, precision=_HIGHEST)    # (4, B, H)
    hh = jnp.matmul(h[None, :, :], w_hh, precision=_HIGHEST)    # (4, B, H)
    pre = ih + b_ih[:, None, :] + hh + b_hh[:, None, :]
    ingate = jax.nn.sigmoid(pre[0])
    forgetgate = jax.nn.sigmoid(pre[1])
    cellgate = jnp.tanh(pre[2])
    outgate = jax.nn.sigmoid(pre[3])
    c_new = forgetgate * c + ingate * cellgate
    h_new = outgate * jnp.tanh(c_new)
    return h_new, c_new


def xavier_uniform(key, shape, fan_in, fan_out, dtype=jnp.float32):
    limit = (6.0 / (fan_in + fan_out)) ** 0.5
    return jax.random.uniform(key, shape, dtype, minval=-limit, maxval=limit)


if __name__ == "__main__":
    hidden_size = 32
    input_size = 32
    batch = 8
    seq_len = 16

    key = jax.random.PRNGKey(0)
    k = jax.random.split(key, 8)

    # Parameters with the shapes declared in the PyTorch __init__.
    w_ih = xavier_uniform(k[0], (4, input_size, hidden_size), input_size, hidden_size)
    w_hh = xavier_uniform(k[1], (4, input_size, hidden_size), input_size, hidden_size)
    b_ih = jax.random.normal(k[2], (4, hidden_size), jnp.float32)
    b_hh = jax.random.normal(k[3], (4, hidden_size), jnp.float32)

    # Pack once, outside the jitted per-call path.
    wx, wh, b = jax.block_until_ready(pack_lstm_params(w_ih, w_hh, b_ih, b_hh))

    x = jax.random.normal(k[4], (batch, input_size), jnp.float32)
    h0 = jax.random.normal(k[5], (batch, input_size), jnp.float32)
    c0 = jax.random.normal(k[6], (batch, hidden_size), jnp.float32)

    # ---- single cell: matches the PyTorch module forward exactly ----
    h1, c1 = lstm_cell(x, h0, c0, wx, wh, b)
    jax.block_until_ready((h1, c1))
    h1_ref, c1_ref = lstm_cell_reference(x, h0, c0, w_ih, w_hh, b_ih, b_hh)
    assert jnp.allclose(h1, h1_ref, atol=1e-5, rtol=1e-5)
    assert jnp.allclose(c1, c1_ref, atol=1e-5, rtol=1e-5)

    # ---- fused sequence: seq_len cell steps in ONE kernel launch ----
    xs = jax.random.normal(k[7], (seq_len, batch, input_size), jnp.float32)
    h_seq, c_last = lstm_sequence(xs, h0, c0, wx, wh, b)
    jax.block_until_ready((h_seq, c_last))

    h_r, c_r = h0, c0
    hs_ref = []
    for t in range(seq_len):
        h_r, c_r = lstm_cell_reference(xs[t], h_r, c_r, w_ih, w_hh, b_ih, b_hh)
        hs_ref.append(h_r)
    hs_ref = jnp.stack(hs_ref)
    assert jnp.allclose(h_seq, hs_ref, atol=1e-4, rtol=1e-4)
    assert jnp.allclose(c_last, c_r, atol=1e-4, rtol=1e-4)

    print("KERNEL_OK")
</pallas_src>

<mosaic_0001>
module attributes {stable_mosaic.version = 11 : i64} {
  func.func @lstm_cell_kernel(%arg0: memref<8x32xf32, #tpu.memory_space<vmem>>, %arg1: memref<8x32xf32, #tpu.memory_space<vmem>>, %arg2: memref<8x32xf32, #tpu.memory_space<vmem>>, %arg3: memref<32x128xf32, #tpu.memory_space<vmem>>, %arg4: memref<32x128xf32, #tpu.memory_space<vmem>>, %arg5: memref<1x128xf32, #tpu.memory_space<vmem>>, %arg6: memref<8x32xf32, #tpu.memory_space<vmem>>, %arg7: memref<8x32xf32, #tpu.memory_space<vmem>>) attributes {dimension_semantics = [], scalar_prefetch = 0 : i64, scratch_operands = 0 : i64, tpu.core_type = #tpu.core_type<tc>} {
    %c0 = arith.constant 0 : index
    %c0_0 = arith.constant 0 : index
    %0 = vector.load %arg0[%c0, %c0_0] : memref<8x32xf32, #tpu.memory_space<vmem>>, vector<8x32xf32>
    %c0_1 = arith.constant 0 : index
    %c0_2 = arith.constant 0 : index
    %1 = vector.load %arg3[%c0_1, %c0_2] : memref<32x128xf32, #tpu.memory_space<vmem>>, vector<32x128xf32>
    %cst = arith.constant dense<0.000000e+00> : vector<8x128xf32>
    %2 = tpu.matmul %0, %1, %cst {dimension_numbers = #tpu.dot_dimension_numbers<[1], [0], [0], [1], [0, 0, 1, 1], [], []>, precision = #tpu.contract_precision<fp32>} : vector<8x32xf32>, vector<32x128xf32>, vector<8x128xf32> -> vector<8x128xf32>
    %c0_3 = arith.constant 0 : index
    %c0_4 = arith.constant 0 : index
    %3 = vector.load %arg1[%c0_3, %c0_4] : memref<8x32xf32, #tpu.memory_space<vmem>>, vector<8x32xf32>
    %c0_5 = arith.constant 0 : index
    %c0_6 = arith.constant 0 : index
    %4 = vector.load %arg4[%c0_5, %c0_6] : memref<32x128xf32, #tpu.memory_space<vmem>>, vector<32x128xf32>
    %cst_7 = arith.constant dense<0.000000e+00> : vector<8x128xf32>
    %5 = tpu.matmul %3, %4, %cst_7 {dimension_numbers = #tpu.dot_dimension_numbers<[1], [0], [0], [1], [0, 0, 1, 1], [], []>, precision = #tpu.contract_precision<fp32>} : vector<8x32xf32>, vector<32x128xf32>, vector<8x128xf32> -> vector<8x128xf32>
    %6 = arith.addf %2, %5 : vector<8x128xf32>
    %c0_8 = arith.constant 0 : index
    %c0_9 = arith.constant 0 : index
    %7 = vector.load %arg5[%c0_8, %c0_9] : memref<1x128xf32, #tpu.memory_space<vmem>>, vector<1x128xf32>
    %8 = vector.broadcast %7 : vector<1x128xf32> to vector<8x128xf32>
    %9 = arith.addf %6, %8 : vector<8x128xf32>
    %c0_10 = arith.constant 0 : index
    %c0_11 = arith.constant 0 : index
    %10 = vector.load %arg2[%c0_10, %c0_11] : memref<8x32xf32, #tpu.memory_space<vmem>>, vector<8x32xf32>
    %11 = tpu.iota {dimensions = array<i32: 1>} : vector<8x128xi32>
    %c96_i32 = arith.constant 96 : i32
    %12 = vector.broadcast %c96_i32 : i32 to vector<8x128xi32>
    %13 = arith.cmpi slt, %11, %12 : vector<8x128xi32>
    %14 = arith.negf %9 : vector<8x128xf32>
    %15 = math.exp %14 : vector<8x128xf32>
    %cst_12 = arith.constant 1.000000e+00 : f32
    %16 = vector.broadcast %cst_12 : f32 to vector<8x128xf32>
    %17 = arith.addf %16, %15 : vector<8x128xf32>
    %18 = arith.divf %16, %17 : vector<8x128xf32>
    %19 = math.tanh %9 : vector<8x128xf32>
    %20 = arith.select %13, %18, %19 : vector<8x128xi1>, vector<8x128xf32>
    %21 = vector.extract_strided_slice %20 {offsets = [0, 0], sizes = [8, 32], strides = [1, 1]} : vector<8x128xf32> to vector<8x32xf32>
    %22 = vector.extract_strided_slice %20 {offsets = [0, 32], sizes = [8, 32], strides = [1, 1]} : vector<8x128xf32> to vector<8x32xf32>
    %23 = vector.extract_strided_slice %20 {offsets = [0, 64], sizes = [8, 32], strides = [1, 1]} : vector<8x128xf32> to vector<8x32xf32>
    %24 = vector.extract_strided_slice %20 {offsets = [0, 96], sizes = [8, 32], strides = [1, 1]} : vector<8x128xf32> to vector<8x32xf32>
    %25 = arith.mulf %22, %10 : vector<8x32xf32>
    %26 = arith.mulf %21, %24 : vector<8x32xf32>
    %27 = arith.addf %25, %26 : vector<8x32xf32>
    %28 = math.tanh %27 : vector<8x32xf32>
    %29 = arith.mulf %23, %28 : vector<8x32xf32>
    %c0_13 = arith.constant 0 : index
    %c0_14 = arith.constant 0 : index
    %30 = vector.load %arg6[%c0_13, %c0_14] : memref<8x32xf32, #tpu.memory_space<vmem>>, vector<8x32xf32>
    tpu.vector_store %arg6[%c0_13, %c0_14], %29 {strides = array<i32>} : memref<8x32xf32, #tpu.memory_space<vmem>>, vector<8x32xf32>,
    %c0_15 = arith.constant 0 : index
    %c0_16 = arith.constant 0 : index
    %31 = vector.load %arg7[%c0_15, %c0_16] : memref<8x32xf32, #tpu.memory_space<vmem>>, vector<8x32xf32>
    tpu.vector_store %arg7[%c0_15, %c0_16], %27 {strides = array<i32>} : memref<8x32xf32, #tpu.memory_space<vmem>>, vector<8x32xf32>,
    return
  }
}

</mosaic_0001>

<bundles_post_ra>
// kernel: lstm_cell.1
= control target key start
LH: loop header
LB: loop body
LE: loop exit
PB: predicated region body
PF: predicated region fallthrough
CT: control target
= control target key end

     0   :  { %13 = vsyncpa [#allocation3], 0  ;;  %s1782_s0 = inlined_call_operand.vmem [shape: f32[8,32], index: 0, kind: input, shape index: {}]   ;;  %s1783_s1 = inlined_call_operand.hbm [shape: f32[8,32], index: 1, kind: input, shape index: {}, may-alias: {1,6}]   ;;  %s1784_s2 = inlined_call_operand.hbm [shape: f32[8,32], index: 2, kind: input, shape index: {}, may-alias: {2,7}]   ;;  %s1785_s3 = inlined_call_operand.vmem [shape: f32[32,128], index: 3, kind: input, shape index: {}]   ;;  %s1786_s4 = inlined_call_operand.hbm [shape: f32[32,128], index: 4, kind: input, shape index: {}]   ;;  %s1787_s5 = inlined_call_operand.vmem [shape: f32[1,128], index: 5, kind: input, shape index: {}]   ;;  %s1788_s6 = inlined_call_operand.hbm [shape: f32[8,32], index: 6, kind: output, shape index: {0}, may-alias: {1,6}]   ;;  %s1789_s7 = inlined_call_operand.hbm [shape: f32[8,32], index: 7, kind: output, shape index: {1}, may-alias: {2,7}]  }
   0x1   :  { %14 = vsyncpa [#allocation6], 0 }
   0x2   :  { %15 = vsyncpa [#allocation4], 0 }
   0x3   :  { %16 = vsyncpa [#allocation10], 0  ;;  %s1537_s24 = smov [#allocation5]   ;;  %s1538_s26 = smov [#allocation2]  }
   0x4   :  { %s35_s25 = sshll.u32 %s1537_s24, 4  ;;  %s25_s27 = sshll.u32 %s1538_s26, 4  ;;  %s36_s25 = int_to_ptr.vmem [resolvable:$true] %s35_s25  ;;  %s26_s27 = int_to_ptr.vmem [resolvable:$true] %s25_s27 }
   0x5   :  { %s1419_s30 = scalar_lea.hbm %s1784_s2, 128 }
   0x6   :  { %p1420_p0 = scmp.ne.s32.totalorder %s1784_s2, %s1419_s30  ;;  %p1423_p1 = scmp.lt.u32.totalorder %s1419_s30, %s1784_s2 }
   0x8   :  { %p1425_p2 = pnand %p1423_p1, %p1420_p0 }
   0xa   :  { %1428 = shalt.err (!%p1425_p2)
}
   0xb   :  { %s1429_s12 = scalar_lea.vmem %s36_s25, 128  ;;  %p1434_p4 = scmp.lt.s32.totalorder %s36_s25, %s36_s25 }
   0xc   :  { %p1430_p3 = scmp.ne.s32.totalorder %s36_s25, %s1429_s12  ;;  %p1435_p5 = scmp.lt.s32.totalorder %s1429_s12, %s1429_s12 }
   0xe   :  { %p1436_p6 = por %p1435_p5, %p1434_p4 }
  0x10   :  { %p1437_p7 = pnand %p1436_p6, %p1430_p3 }
  0x12   :  { %1440 = shalt.err (!%p1437_p7)
}
  0x13   :  { %38 = dma.hbm_to_vmem [thread:$0]  %s1784_s2, 128, %s36_s25, [#allocation6]  }
  0x14   :  { %s1441_s17 = scalar_lea.hbm %s1783_s1, 128 }
  0x15   :  { %p1442_p8 = scmp.ne.s32.totalorder %s1783_s1, %s1441_s17  ;;  %p1445_p9 = scmp.lt.u32.totalorder %s1441_s17, %s1783_s1 }
  0x17   :  { %p1447_p10 = pnand %p1445_p9, %p1442_p8 }
  0x19   :  { %1450 = shalt.err (!%p1447_p10)
}
  0x1a   :  { %s1451_s22 = scalar_lea.vmem %s26_s27, 128  ;;  %p1456_p12 = scmp.lt.s32.totalorder %s26_s27, %s26_s27 }
  0x1b   :  { %p1452_p11 = scmp.ne.s32.totalorder %s26_s27, %s1451_s22  ;;  %p1457_p13 = scmp.lt.s32.totalorder %s1451_s22, %s1451_s22 }
  0x1d   :  { %p1458_p0 = por %p1457_p13, %p1456_p12 }
  0x1f   :  { %p1459_p1 = pnand %p1458_p0, %p1452_p11 }
  0x21   :  { %1462 = shalt.err (!%p1459_p1)
}
  0x22   :  { %28 = dma.hbm_to_vmem [thread:$0]  %s1783_s1, 128, %s26_s27, [#allocation3]  }
  0x23   :  { %s1539_s24 = smov [#allocation7]   ;;  %s1463_s29 = scalar_lea.hbm %s1786_s4, 512 }
  0x24   :  { %s46_s25 = sshll.u32 %s1539_s24, 4  ;;  %p1464_p2 = scmp.ne.s32.totalorder %s1786_s4, %s1463_s29  ;;  %s47_s25 = int_to_ptr.vmem [resolvable:$true] %s46_s25 }
  0x25   :  { %p1467_p3 = scmp.lt.u32.totalorder %s1463_s29, %s1786_s4 }
  0x27   :  { %p1469_p4 = pnand %p1467_p3, %p1464_p2 }
  0x29   :  { %1472 = shalt.err (!%p1469_p4)
}
  0x2a   :  { %s1473_s11 = scalar_lea.vmem %s47_s25, 512  ;;  %p1478_p6 = scmp.lt.s32.totalorder %s47_s25, %s47_s25 }
  0x2b   :  { %p1474_p5 = scmp.ne.s32.totalorder %s47_s25, %s1473_s11  ;;  %p1479_p7 = scmp.lt.s32.totalorder %s1473_s11, %s1473_s11 }
  0x2d   :  { %p1480_p8 = por %p1479_p7, %p1478_p6 }
  0x2f   :  { %p1481_p9 = pnand %p1480_p8, %p1474_p5 }
  0x31   :  { %1484 = shalt.err (!%p1481_p9)
}
  0x32   :  { %s1540_s1 = smov 128   ;;  %s1541_s27 = smov 8  }
  0x33   :  { %52 = dma.hbm_to_vmem [thread:$0]  %s1786_s4, 512, %s47_s25, [#allocation6], %s1540_s1, %s1540_s1, %s1541_s27  }
  0x34   :  { %1529 = dma.done.wait [#allocation3], 128  }
  0x35   :  { %1530 = vsyncadd [#allocation3], 4294967168 }
  0x36   :  { %1531 = dma.done.wait [#allocation6], 640  }
  0x37   :  { %1532 = vsyncadd [#allocation6], 4294966656  ;;  %v1542_v0 = vmov 0.0|0.0   ;;  %vm1543_vm0 = vmmov 0   ;;  %v1544_v1 = vmov 0.0   ;;  %vm74_vm1 = vcmask 261120  }
  0x38   :  { %1326 = vmatprep.subr.bf16.mxu0 %v1542_v0  ;;  %1332 = vmatprep.subr.bf16.mxu1 %v1542_v0  ;;  %v70_v2 = vld [vmem:[#allocation7] sm:$0xff]  ;;  %v71_v3 = vld [vmem:[#allocation7 + $0x8] sm:$0xff]  ;;  %v72_v4 = vld [vmem:[#allocation7 + $0x10] sm:$0xff]  ;;  %s1545_s2 = smov 32   ;;  %s1547_s23 = smov [#allocation9]  }
  0x39   :  { %1202 = vmatprep.mubr.msk.f32.mxu0 %vm1543_vm0, %v1544_v1  ;;  %1213 = vmatprep.mubr.msk.f32.mxu1 %vm1543_vm0, %v1544_v1  ;;  %v79_v5 = vand.u32 4294901760, %v70_v2  ;;  %v82_v6 = vand.u32 4294901760, %v71_v3  ;;  %v73_v7 = vld [vmem:[#allocation7 + $0x18] sm:$0xff]  ;;  %v85_v8 = vand.u32 4294901760, %v72_v4  ;;  %v69_v9 = vld [vmem:[#allocation2] sm:$0xff]  ;;  %v67_v43 = vld [vmem:[%s1785_s3 + $0x10] sm:$0xff] }
  0x3a   :  { %v88_v10 = vand.u32 4294901760, %v73_v7  ;;  %v76_v11 = vsel %vm74_vm1, %v69_v9, 0  ;;  %v65_v34 = vld [vmem:[%s1785_s3] sm:$0xff]  ;;  %v66_v35 = vld [vmem:[%s1785_s3 + $0x8] sm:$0xff]  ;;  %v68_v44 = vld [vmem:[%s1785_s3 + $0x18] sm:$0xff]  ;;  %v573_v49 = vand.u32 4294901760, %v67_v43 }
  0x3b   :  { %v1633_v12 = vpack.c.bf16 %v82_v6, %v79_v5  ;;  %v159_v13 = vsub.f32 %v70_v2, %v79_v5  ;;  %v166_v14 = vsub.f32 %v71_v3, %v82_v6  ;;  %v1635_v15 = vsub.f32 %v72_v4, %v85_v8  ;;  %v64_v39 = vld [vmem:[%s1782_s0] sm:$0xff]  ;;  %s1118_s24 = sshll.u32 %s1547_s23, 4  ;;  %s1548_s25 = smov 64   ;;  %s1119_s24 = int_to_ptr.vmem [resolvable:$true] %s1118_s24 }
  0x3c   :  { %v1637_v16 = vsub.f32 %v73_v7, %v88_v10  ;;  %v1639_v17 = vand.u32 4294901760, %v76_v11  ;;  %v1642_v18 = vpack.c.bf16 %v88_v10, %v85_v8  ;;  %v567_v41 = vand.u32 4294901760, %v65_v34  ;;  %s1485_s26 = scalar_lea.vmem %s1119_s24, 128  ;;  %p1490_p11 = scmp.lt.s32.totalorder %s1119_s24, %s1119_s24 }
  0x3d   :  { %1328 = vmatpush3.bf16.msra.mxu0 %v1633_v12  ;;  %v160_v19 = vand.u32 4294901760, %v159_v13  ;;  %v167_v20 = vand.u32 4294901760, %v166_v14  ;;  %v174_v21 = vand.u32 4294901760, %v1635_v15  ;;  %v1339_v37 = vpack.c.bf16 %v166_v14, %v159_v13  ;;  %p1486_p10 = scmp.ne.s32.totalorder %s1119_s24, %s1485_s26  ;;  %p1491_p12 = scmp.lt.s32.totalorder %s1485_s26, %s1485_s26 }
  0x3e   :  { %1329 = vmatprep.subr.bf16.mxu0 %v1542_v0  ;;  %v1647_v22 = vsub.f32 %v76_v11, %v1639_v17  ;;  %v181_v23 = vand.u32 4294901760, %v1637_v16  ;;  %v570_v42 = vand.u32 4294901760, %v66_v35  ;;  %v1342_v45 = vpack.c.bf16 %v1637_v16, %v1635_v15 }
  0x3f   :  { %v161_v24 = vsub.f32 %v159_v13, %v160_v19  ;;  %v168_v25 = vsub.f32 %v166_v14, %v167_v20  ;;  %v175_v26 = vsub.f32 %v1635_v15, %v174_v21  ;;  %v564_v46 = vsel %vm74_vm1, %v64_v39, 0  ;;  %p1492_p13 = por %p1491_p12, %p1490_p11 }
  0x40   :  { %v149_v27 = vand.u32 4294901760, %v1647_v22  ;;  %v182_v28 = vsub.f32 %v1637_v16, %v181_v23  ;;  %v1678_v47 = vsub.f32 %v65_v34, %v567_v41  ;;  %v1680_v48 = vsub.f32 %v66_v35, %v570_v42 }
  0x41   :  { %1331 = vmatpush3.bf16.msra.mxu0 %v1642_v18  ;;  %v162_v29 = vand.u32 4294901760, %v161_v24  ;;  %v169_v30 = vand.u32 4294901760, %v168_v25  ;;  %v176_v31 = vand.u32 4294901760, %v175_v26  ;;  %v576_v50 = vand.u32 4294901760, %v68_v44  ;;  %p1493_p0 = pnand %p1492_p13, %p1486_p10 }
  0x42   :  { %1338 = vmatprep.subr.bf16.mxu0 %v1542_v0  ;;  %v150_v32 = vsub.f32 %v1647_v22, %v149_v27  ;;  %v183_v33 = vand.u32 4294901760, %v182_v28  ;;  %v1683_v51 = vand.u32 4294901760, %v564_v46  ;;  %v1351_v52 = vpack.c.bf16 %v167_v20, %v160_v19 }
  0x43   :  { %v1333_v36 = vpack.c.bf16 %v169_v30, %v162_v29  ;;  %v1690_v53 = vsub.f32 %v67_v43, %v573_v49  ;;  %v1692_v54 = vsub.f32 %v68_v44, %v576_v50  ;;  %v648_v55 = vand.u32 4294901760, %v1678_v47 }
  0x44   :  { %v151_v38 = vand.u32 4294901760, %v150_v32  ;;  %v1336_v40 = vpack.c.bf16 %v183_v33, %v176_v31  ;;  %v655_v56 = vand.u32 4294901760, %v1680_v48  ;;  %v1699_v57 = vsub.f32 %v564_v46, %v1683_v51 }
  0x45   :  { %1334 = vmatpush3.bf16.msra.mxu1 %v1333_v36  ;;  %v1354_v58 = vpack.c.bf16 %v181_v23, %v174_v21  ;;  %v649_v59 = vsub.f32 %v1678_v47, %v648_v55  ;;  %v662_v61 = vand.u32 4294901760, %v1690_v53  ;;  %v669_v62 = vand.u32 4294901760, %v1692_v54 }
  0x46   :  { %1203 = vmatmul.mubr.f32.vlgmr.msra.gmra.mrb[0].mxu0 %v151_v38  ;;  %1335 = vmatprep.subr.bf16.mxu1 %v1542_v0  ;;  %v656_v60 = vsub.f32 %v1680_v48, %v655_v56  ;;  %v637_v63 = vand.u32 4294901760, %v1699_v57  ;;  %v1363_v2 = vpack.c.bf16 %v570_v42, %v567_v41  ;;  %v1366_v8 = vpack.c.bf16 %v576_v50, %v573_v49  ;;  %v1132_v49 = vld [vmem:[%s1787_s5] ss:$0 sm:$0xff]  ;;  %s1546_s5 = smov 96  }
  0x47   :  { %1340 = vmatpush3.bf16.msra.mxu0 %v1339_v37  ;;  %1224 = vmatprep.mubr.msk.f32.mxu0 %vm1543_vm0, %v1544_v1  ;;  %v650_v3 = vand.u32 4294901760, %v649_v59  ;;  %v663_v5 = vsub.f32 %v1690_v53, %v662_v61  ;;  %v670_v6 = vsub.f32 %v1692_v54, %v669_v62  ;;  %v1375_v13 = vpack.c.bf16 %v1680_v48, %v1678_v47 }
  0x48   :  { %1341 = vmatprep.subr.bf16.mxu0 %v1542_v0  ;;  %v657_v4 = vand.u32 4294901760, %v656_v60  ;;  %v638_v7 = vsub.f32 %v1699_v57, %v637_v63  ;;  %v1378_v15 = vpack.c.bf16 %v1692_v54, %v1690_v53  ;;  %v1387_v16 = vpack.c.bf16 %v655_v56, %v648_v55 }
  0x49   :  { %1337 = vmatpush3.bf16.msra.mxu1 %v1336_v40  ;;  %v664_v10 = vand.u32 4294901760, %v663_v5  ;;  %v671_v11 = vand.u32 4294901760, %v670_v6  ;;  %v1060_v56 = vlaneseq }
  0x4a   :  { %1344 = vmatprep.subr.bf16.mxu1 %v1542_v0  ;;  %v1369_v9 = vpack.c.bf16 %v657_v4, %v650_v3 }
  0x4b   :  { %1343 = vmatpush3.bf16.msra.mxu0 %v1342_v45  ;;  %v1372_v14 = vpack.c.bf16 %v671_v11, %v664_v10 }
  0x4c   :  { %1214 = vmatmul.mubr.f32.vlgmr.msra.gmra.mrb[0].mxu1 %v1639_v17  ;;  %1350 = vmatprep.subr.bf16.mxu0 %v1542_v0 }
  0x4d   :  { %1346 = vmatpush3.bf16.msra.mxu1 %v1633_v12  ;;  %1235 = vmatprep.mubr.msk.f32.mxu1 %vm1543_vm0, %v1544_v1 }
  0x4e   :  { %1225 = vmatmul.mubr.f32.vlgmr.msra.gmra.mrb[2].mxu0 %v1647_v22  ;;  %1347 = vmatprep.subr.bf16.mxu1 %v1542_v0 }
  0x4f   :  { %1352 = vmatpush3.bf16.msra.mxu0 %v1351_v52  ;;  %1246 = vmatprep.mubr.msk.f32.mxu0 %vm1543_vm0, %v1544_v1 }
  0x50   :  { %1353 = vmatprep.subr.bf16.mxu0 %v1542_v0 }
  0x51   :  { %1349 = vmatpush3.bf16.msra.mxu1 %v1642_v18 }
  0x52   :  { %1356 = vmatprep.subr.bf16.mxu1 %v1542_v0 }
  0x53   :  { %1355 = vmatpush3.bf16.msra.mxu0 %v1354_v58 }
  0x54   :  { %1236 = vmatmul.mubr.f32.vlgmr.msra.gmra.mrb[2].mxu1 %v149_v27  ;;  %1362 = vmatprep.subr.bf16.mxu0 %v1542_v0 }
  0x55   :  { %1358 = vmatpush3.bf16.msra.mxu1 %v1633_v12  ;;  %1257 = vmatprep.mubr.msk.f32.mxu1 %vm1543_vm0, %v1544_v1  ;;  %v639_v12 = vand.u32 4294901760, %v638_v7 }
  0x56   :  { %1247 = vmatmul.mubr.f32.vlgmr.msra.gmra.mrb[4].mxu0 %v1639_v17  ;;  %1359 = vmatprep.subr.bf16.mxu1 %v1542_v0 }
  0x57   :  { %1364 = vmatpush3.bf16.msra.mxu0 %v1363_v2  ;;  %1268 = vmatprep.mubr.msk.f32.mxu0 %vm1543_vm0, %v1544_v1 }
  0x58   :  { %1365 = vmatprep.subr.bf16.mxu0 %v1542_v0 }
  0x59   :  { %1361 = vmatpush3.bf16.msra.mxu1 %v1642_v18 }
  0x5a   :  { %1368 = vmatprep.subr.bf16.mxu1 %v1542_v0 }
  0x5b   :  { %1367 = vmatpush3.bf16.msra.mxu0 %v1366_v8 }
  0x5c   :  { %1258 = vmatmul.mubr.f32.vlgmr.msra.gmra.mrb[4].mxu1 %v1639_v17  ;;  %1374 = vmatprep.subr.bf16.mxu0 %v1542_v0  ;;  %v1390_v17 = vpack.c.bf16 %v669_v62, %v662_v61  ;;  %v1059_v61 = vld [vmem:[#allocation5] sm:$0xff] }
  0x5d   :  { %1370 = vmatpush3.bf16.msra.mxu1 %v1369_v9  ;;  %1279 = vmatprep.mubr.msk.f32.mxu1 %vm1543_vm0, %v1544_v1 }
  0x5e   :  { %1269 = vmatmul.mubr.f32.vlgmr.msra.gmra.mrb[6].mxu0 %v639_v12  ;;  %1371 = vmatprep.subr.bf16.mxu1 %v1542_v0 }
  0x5f   :  { %1376 = vmatpush3.bf16.msra.mxu0 %v1375_v13  ;;  %1290 = vmatprep.mubr.msk.f32.mxu0 %vm1543_vm0, %v1544_v1 }
  0x60   :  { %1377 = vmatprep.subr.bf16.mxu0 %v1542_v0 }
  0x61   :  { %1373 = vmatpush3.bf16.msra.mxu1 %v1372_v14 }
  0x62   :  { %1380 = vmatprep.subr.bf16.mxu1 %v1542_v0 }
  0x63   :  { %1379 = vmatpush3.bf16.msra.mxu0 %v1378_v15 }
  0x64   :  { %1280 = vmatmul.mubr.f32.vlgmr.msra.gmra.mrb[6].mxu1 %v1683_v51  ;;  %1386 = vmatprep.subr.bf16.mxu0 %v1542_v0 }
  0x65   :  { %1382 = vmatpush3.bf16.msra.mxu1 %v1363_v2  ;;  %1301 = vmatprep.mubr.msk.f32.mxu1 %vm1543_vm0, %v1544_v1 }
  0x66   :  { %1291 = vmatmul.mubr.f32.vlgmr.msra.gmra.mrb[8].mxu0 %v1699_v57  ;;  %1383 = vmatprep.subr.bf16.mxu1 %v1542_v0  ;;  %v1061_v57 = vand.u32 127, %v1060_v56 }
  0x67   :  { %1388 = vmatpush3.bf16.msra.mxu0 %v1387_v16  ;;  %1312 = vmatprep.mubr.msk.f32.mxu0 %vm1543_vm0, %v1544_v1 }
  0x68   :  { %1389 = vmatprep.subr.bf16.mxu0 %v1542_v0  ;;  %vm1062_vm2 = vcmp.lt.s32.totalorder %v1061_v57, 96 }
  0x69   :  { %1385 = vmatpush3.bf16.msra.mxu1 %v1366_v8 }
  0x6a   :  { %1392 = vmatprep.subr.bf16.mxu1 %v1542_v0 }
  0x6b   :  { %1391 = vmatpush3.bf16.msra.mxu0 %v1390_v17 }
  0x6c   :  { %1302 = vmatmul.mubr.f32.vlgmr.msra.gmra.mrb[8].mxu1 %v637_v63 }
  0x6d   :  { %1394 = vmatpush3.bf16.msra.mxu1 %v1363_v2  ;;  %1323 = vmatprep.mubr.msk.f32.mxu1 %vm1543_vm0, %v1544_v1 }
  0x6e   :  { %1313 = vmatmul.mubr.f32.vlgmr.msra.gmra.mrb[10].mxu0 %v1683_v51  ;;  %1395 = vmatprep.subr.bf16.mxu1 %v1542_v0 }
  0x71   :  { %1397 = vmatpush3.bf16.msra.mxu1 %v1366_v8 }
  0x74   :  { %1324 = vmatmul.mubr.f32.vlgmr.msra.gmra.mrb[10].mxu1 %v1683_v51 }
 0x119   :  { %v153_v18 = vpop.f32.mrb[0].mxu0 }
 0x11a   :  { %v1204_v19 = vpop.f32.mrb[1].mxu0 }
 0x11f   :  { %v244_v20 = vpop.f32.mrb[0].mxu1 }
 0x120   :  { %v245_v21 = vadd.f32 %v244_v20, %v153_v18  ;;  %v1215_v22 = vpop.f32.mrb[1].mxu1 }
 0x121   :  { %v324_v23 = vpop.f32.mrb[2].mxu0 }
 0x122   :  { %v325_v24 = vadd.f32 %v324_v23, %v245_v21  ;;  %v1226_v25 = vpop.f32.mrb[3].mxu0 }
 0x127   :  { %v401_v26 = vpop.f32.mrb[2].mxu1 }
 0x128   :  { %v402_v27 = vadd.f32 %v401_v26, %v325_v24  ;;  %v1237_v28 = vpop.f32.mrb[3].mxu1 }
 0x129   :  { %v484_v29 = vpop.f32.mrb[4].mxu0 }
 0x12a   :  { %v485_v1 = vadd.f32 %v484_v29, %v402_v27  ;;  %v1248_v30 = vpop.f32.mrb[5].mxu0 }
 0x12f   :  { %v559_v31 = vpop.f32.mrb[4].mxu1 }
 0x130   :  { %v560_v32 = vadd.f32 %v559_v31, %v485_v1  ;;  %v1259_v0 = vpop.f32.mrb[5].mxu1 }
 0x131   :  { %v641_v33 = vpop.f32.mrb[6].mxu0 }
 0x132   :  { %v642_v34 = vadd.f32 %v641_v33, %v560_v32  ;;  %v1270_v35 = vpop.f32.mrb[7].mxu0 }
 0x137   :  { %v732_v36 = vpop.f32.mrb[6].mxu1 }
 0x138   :  { %v733_v37 = vadd.f32 %v732_v36, %v642_v34  ;;  %v1281_v38 = vpop.f32.mrb[7].mxu1 }
 0x139   :  { %v812_v39 = vpop.f32.mrb[8].mxu0 }
 0x13a   :  { %v813_v40 = vadd.f32 %v812_v39, %v733_v37  ;;  %v1292_v41 = vpop.f32.mrb[9].mxu0 }
 0x13f   :  { %v889_v42 = vpop.f32.mrb[8].mxu1 }
 0x140   :  { %v890_v43 = vadd.f32 %v889_v42, %v813_v40  ;;  %v1303_v44 = vpop.f32.mrb[9].mxu1 }
 0x141   :  { %v972_v45 = vpop.f32.mrb[10].mxu0 }
 0x142   :  { %v973_v46 = vadd.f32 %v972_v45, %v890_v43  ;;  %v1314_v47 = vpop.f32.mrb[11].mxu0 }
 0x147   :  { %v1047_v48 = vpop.f32.mrb[10].mxu1 }
 0x148   :  { %v1048_v50 = vadd.f32 %v1047_v48, %v973_v46  ;;  %v1325_v51 = vpop.f32.mrb[11].mxu1 }
 0x14a   :  { %v1058_v52 = vadd.f32 %v1132_v49, %v1048_v50 }
 0x14c   :  { %v1133_v53 = vmul.f32 -1.442695, %v1058_v52 }
 0x14e   :  { %1411 = vpow2.f32 %v1133_v53 }
 0x14f   :  { %1413 = vtanh.f32 %v1058_v52 }
 0x158   :  { %v1412_v54 = vpop.eup %1411 }
 0x159   :  { %v1066_v55 = vadd.f32 1.0, %v1412_v54  ;;  %v1414_v58 = vpop.eup %1413 }
 0x15b   :  { %1415 = vrcp.f32 %v1066_v55 }
 0x165   :  { %v1416_v59 = vpop.eup %1415 }
 0x166   :  { %v1070_v60 = vsel %vm1062_vm2, %v1416_v59, %v1414_v58 }
 0x167   :  { %1077 = vrot.lane.b32.xlu0 %v1070_v60, %s1545_s2 }
 0x16b   :  { %1072 = vrot.lane.b32.xlu0 %v1059_v61, %s1545_s2 }
 0x1d9   :  { %v1078_v62 = vpop.permute.xlu0 %1077 }
 0x1da   :  { %v1080_v63 = vmul.f32 %v1078_v62, %v1070_v60 }
 0x1dc   :  { %1082 = vrot.lane.b32.xlu1 %v1080_v63, %s1545_s2 }
 0x1dd   :  { %v1073_v2 = vpop.permute.xlu0 %1072 }
 0x1de   :  { %v1075_v3 = vmul.f32 %v1073_v2, %v1070_v60 }
 0x24e   :  { %v1083_v4 = vpop.permute.xlu1 %1082 }
 0x24f   :  { %v1085_v5 = vadd.f32 %v1083_v4, %v1075_v3 }
 0x251   :  { %1417 = vtanh.f32 %v1085_v5 }
 0x25b   :  { %v1418_v6 = vpop.eup %1417 }
 0x25c   :  { %1088 = vrot.lane.b32.xlu1 %v1418_v6, %s1545_s2 }
 0x260   :  { %1098 = vrot.lane.b32.xlu1 %v1085_v5, %s1546_s5 }
 0x2ce   :  { %v1089_v7 = vpop.permute.xlu1 %1088 }
 0x2cf   :  { %v1091_v8 = vmul.f32 %v1089_v7, %v1070_v60 }
 0x2d1   :  { %1093 = vrot.lane.b32.xlu0 %v1091_v8, %s1548_s25 }
 0x2d2   :  { %v1099_v9 = vpop.permute.xlu1 %1098 }
 0x2d3   :  { %1101 = vst.msk [vmem:[#allocation9] sm:$0xff] %vm74_vm1, %v1099_v9 }
 0x2d4   :  { %1496 = shalt.err (!%p1493_p0)
}
 0x2d5   :  { %s1497_s30 = scalar_lea.hbm %s1789_s7, 128 }
 0x2d6   :  { %p1498_p1 = scmp.ne.s32.totalorder %s1789_s7, %s1497_s30  ;;  %p1501_p2 = scmp.lt.u32.totalorder %s1497_s30, %s1789_s7 }
 0x2d8   :  { %p1503_p3 = pnand %p1501_p2, %p1498_p1 }
 0x2da   :  { %1506 = shalt.err (!%p1503_p3)
}
 0x2db   :  { %1121 = dma.vmem_to_hbm [thread:$0]  %s1119_s24, 128, %s1789_s7, [#allocation10]  }
 0x2dc   :  { %s1549_s12 = smov [#allocation8]  }
 0x2dd   :  { %s1108_s13 = sshll.u32 %s1549_s12, 4  ;;  %s1109_s13 = int_to_ptr.vmem [resolvable:$true] %s1108_s13 }
 0x2de   :  { %s1507_s4 = scalar_lea.vmem %s1109_s13, 128  ;;  %p1512_p5 = scmp.lt.s32.totalorder %s1109_s13, %s1109_s13 }
 0x2df   :  { %p1508_p4 = scmp.ne.s32.totalorder %s1109_s13, %s1507_s4  ;;  %p1513_p6 = scmp.lt.s32.totalorder %s1507_s4, %s1507_s4 }
 0x2e1   :  { %p1514_p7 = por %p1513_p6, %p1512_p5 }
 0x2e3   :  { %p1515_p8 = pnand %p1514_p7, %p1508_p4 }
 0x343   :  { %v1094_v10 = vpop.permute.xlu0 %1093 }
 0x344   :  { %1096 = vst.msk [vmem:[#allocation8] sm:$0xff] %vm74_vm1, %v1094_v10 }
 0x345   :  { %1518 = shalt.err (!%p1515_p8)
}
 0x346   :  { %s1519_s16 = scalar_lea.hbm %s1788_s6, 128 }
 0x347   :  { %p1520_p9 = scmp.ne.s32.totalorder %s1788_s6, %s1519_s16  ;;  %p1523_p10 = scmp.lt.u32.totalorder %s1519_s16, %s1788_s6 }
 0x349   :  { %p1525_p11 = pnand %p1523_p10, %p1520_p9 }
 0x34b   :  { %1528 = shalt.err (!%p1525_p11)
}
 0x34c   :  { %1111 = dma.vmem_to_hbm [thread:$0]  %s1109_s13, 128, %s1788_s6, [#allocation4]  }
 0x34d   :  { %1533 = dma.done.wait [#allocation4], 128  }
 0x34e   :  { %1534 = vsyncadd [#allocation4], 4294967168 }
 0x34f   :  { %1535 = dma.done.wait [#allocation10], 128  }
 0x350   :  { %1536 = vsyncadd [#allocation10], 4294967168 }
 0x351   :  { %1128 = vsyncpa [#allocation3], 1 }
 0x352   :  { %1129 = vsyncpa [#allocation6], 1 }
 0x353   :  { %1130 = vsyncpa [#allocation4], 1 }
 0x354   :  { %1131 = vsyncpa [#allocation10], 1 }

</bundles_post_ra>
